<compile_context>
chip_gen: v7x
topology: tpu7x:2x2x1
jax: 0.10.0
libtpu: 0.0.40
codegen_flags: <defaults>
</compile_context>

<pallas_src>
import jax
import jax.numpy as jnp
from jax import lax
from jax.experimental import pallas as pl
from jax.experimental.pallas import tpu as pltpu

BN_EPS = 1e-5
BN_MOMENTUM = 0.1  # PyTorch BatchNorm2d default


def _make_kernel(n, cin, cout, hw):
    inv_p = 1.0 / float(n * hw)

    def kernel(x_ref, p_ref, gt_ref, out_ref, rmean_ref, loss_ref):
        # x_ref  : (N*Cin,  HW) VMEM   gt_ref/out_ref: (N*Cout, HW) VMEM
        # p_ref  : (Cout*Cin + 4*Cout,) f32 SMEM = [w | b | gamma | beta | rmean0]
        # rmean_ref: (Cout,) SMEM      loss_ref: (1,) SMEM
        off_b = cout * cin
        off_g = off_b + cout
        off_be = off_g + cout
        off_rm = off_be + cout
        w = [[p_ref[o * cin + c] for c in range(cin)] for o in range(cout)]
        b = [p_ref[off_b + o] for o in range(cout)]
        gamma = [p_ref[off_g + o] for o in range(cout)]
        beta = [p_ref[off_be + o] for o in range(cout)]
        rmean0 = [p_ref[off_rm + o] for o in range(cout)]

        # --- 1x1 conv: Cin scalar*vector FMAs per (n, o) row on the VPU ---
        # (conv bias folded out: cancels under BN mean subtraction, re-enters
        #  only via the returned running_mean)
        y = [[None] * cout for _ in range(n)]
        for ni in range(n):
            for o in range(cout):
                row = w[o][0] * x_ref[ni * cin:ni * cin + 1, :]
                for c in range(1, cin):
                    row = row + w[o][c] * x_ref[ni * cin + c:ni * cin + c + 1, :]
                y[ni][o] = row  # (1, HW) f32

        loss_vec = jnp.zeros((1, hw), dtype=jnp.float32)

        for o in range(cout):
            # one-pass biased batch statistics over the N*HW elements of channel o
            sum_v = jnp.sum(y[0][o], axis=1, keepdims=True)            # (1,1)
            ssq_v = jnp.sum(y[0][o] * y[0][o], axis=1, keepdims=True)  # (1,1)
            mean_s = jnp.sum(y[0][o])                                  # scalar (for running_mean)
            for ni in range(1, n):
                sum_v = sum_v + jnp.sum(y[ni][o], axis=1, keepdims=True)
                ssq_v = ssq_v + jnp.sum(y[ni][o] * y[ni][o], axis=1, keepdims=True)
                mean_s = mean_s + jnp.sum(y[ni][o])

            mean_v = sum_v * inv_p
            var_v = jnp.maximum(ssq_v * inv_p - mean_v * mean_v, 0.0)  # clamp: no negative var
            scale_v = gamma[o] * lax.rsqrt(var_v + BN_EPS)             # (1,1), EUP rsqrt
            shift_v = beta[o] - mean_v * scale_v                       # (1,1)

            # folded BN affine + ReLU6: one FMA + clamp per element
            for ni in range(n):
                z = jnp.minimum(jnp.maximum(y[ni][o] * scale_v + shift_v, 0.0), 6.0)
                r = ni * cout + o
                out_ref[r:r + 1, :] = z
                d = z - gt_ref[r:r + 1, :]
                loss_vec = loss_vec + d * d

            # PyTorch train-mode running_mean update; batch mean re-gains conv bias.
            # (running_var is also updated by PyTorch internally but MyBN.forward
            #  never returns it, so it is intentionally not emitted here.)
            batch_mean = mean_s * inv_p + b[o]
            rmean_ref[o] = (1.0 - BN_MOMENTUM) * rmean0[o] + BN_MOMENTUM * batch_mean

        # loss = sum((relu6(bn(conv(img))) - gt_label)^2), scalar in SMEM
        loss_ref[0] = jnp.sum(loss_vec)

    return kernel


def toy_model_forward(img_nchw, gt_nchw, conv_w, conv_b, bn_gamma, bn_beta,
                      bn_running_mean=None):
    """ToyModel forward (return_loss=True path) on TPU via one Pallas kernel.

    img_nchw, gt_nchw: (N, C, H, W) float32
    conv_w: (Cout, Cin, 1, 1), conv_b: (Cout,)
    bn_gamma, bn_beta: (Cout,); bn_running_mean: (Cout,) (defaults to zeros)
    Returns dict with 'loss', 'loss_list', 'loss_dict' plus 'out' (NCHW) and
    'running_mean' for inspection.
    """
    N, C, H, W = img_nchw.shape
    HW = H * W
    Cin = C
    Cout = conv_w.shape[0]
    if bn_running_mean is None:
        bn_running_mean = jnp.zeros((Cout,), jnp.float32)

    # Free reshapes only — no transposes on either side of the kernel.
    x2d = img_nchw.astype(jnp.float32).reshape(N * Cin, HW)
    gt2d = gt_nchw.astype(jnp.float32).reshape(N * Cout, HW)

    # One packed SMEM parameter vector: [w(9) | b(3) | gamma(3) | beta(3) | rmean0(3)]
    params = jnp.concatenate([
        conv_w.reshape(Cout * Cin).astype(jnp.float32),
        conv_b.reshape(Cout).astype(jnp.float32),
        bn_gamma.reshape(Cout).astype(jnp.float32),
        bn_beta.reshape(Cout).astype(jnp.float32),
        bn_running_mean.reshape(Cout).astype(jnp.float32),
    ])

    kernel = _make_kernel(N, Cin, Cout, HW)

    cost = pl.CostEstimate(
        flops=N * Cout * HW * (2 * Cin + 11),
        transcendentals=Cout,
        bytes_accessed=4 * (N * Cin * HW + 2 * N * Cout * HW
                            + int(params.size) + Cout + 1),
    )

    out2d, rmean, loss = pl.pallas_call(
        kernel,
        grid=(),
        in_specs=[
            pl.BlockSpec((N * Cin, HW), lambda: (0, 0)),                # x, lane-dense
            pl.BlockSpec(memory_space=pltpu.MemorySpace.SMEM),          # packed params
            pl.BlockSpec((N * Cout, HW), lambda: (0, 0)),               # gt, lane-dense
        ],
        out_specs=[
            pl.BlockSpec((N * Cout, HW), lambda: (0, 0)),               # out
            pl.BlockSpec(memory_space=pltpu.MemorySpace.SMEM),          # running_mean (Cout,)
            pl.BlockSpec(memory_space=pltpu.MemorySpace.SMEM),          # scalar loss (1,)
        ],
        out_shape=[
            jax.ShapeDtypeStruct((N * Cout, HW), jnp.float32),
            jax.ShapeDtypeStruct((Cout,), jnp.float32),
            jax.ShapeDtypeStruct((1,), jnp.float32),
        ],
        cost_estimate=cost,
    )(x2d, params, gt2d)

    out_nchw = out2d.reshape(N, Cout, H, W)   # free reshape back to NCHW
    loss = loss[0]
    return {
        "loss": loss,
        "loss_list": [loss, loss],
        "loss_dict": {"loss1": loss},
        "out": out_nchw,
        "running_mean": rmean,
    }


def _reference_forward(img, gt, conv_w, conv_b, gamma, beta, rmean0):
    # Pure-JAX reference of the same semantics (sanity check).
    N, C, H, W = img.shape
    w2d = conv_w.reshape(conv_w.shape[0], C)
    y = jnp.einsum("nchw,oc->nohw", img, w2d) + conv_b[None, :, None, None]
    mean = jnp.mean(y, axis=(0, 2, 3))
    var = jnp.mean((y - mean[None, :, None, None]) ** 2, axis=(0, 2, 3))
    yh = (y - mean[None, :, None, None]) / jnp.sqrt(var[None, :, None, None] + BN_EPS)
    z = yh * gamma[None, :, None, None] + beta[None, :, None, None]
    z = jnp.clip(z, 0.0, 6.0)
    loss = jnp.sum((z - gt) ** 2)
    rmean = (1.0 - BN_MOMENTUM) * rmean0 + BN_MOMENTUM * mean
    return z, loss, rmean


if __name__ == "__main__":
    key = jax.random.PRNGKey(0)
    k_img, k_gt, k_w, k_b = jax.random.split(key, 4)

    N, C, H, W = 2, 3, 16, 16
    img = jax.random.normal(k_img, (N, C, H, W), dtype=jnp.float32)
    gt_label = jax.random.normal(k_gt, (N, C, H, W), dtype=jnp.float32)

    # Conv2d(3, 3, 1) and BatchNorm2d(3)-style parameters.
    conv_w = 0.1 * jax.random.normal(k_w, (3, 3, 1, 1), dtype=jnp.float32)
    conv_b = 0.1 * jax.random.normal(k_b, (3,), dtype=jnp.float32)
    bn_gamma = jnp.ones((3,), dtype=jnp.float32)
    bn_beta = jnp.zeros((3,), dtype=jnp.float32)
    bn_rmean0 = jnp.zeros((3,), dtype=jnp.float32)

    result = toy_model_forward(img, gt_label, conv_w, conv_b, bn_gamma, bn_beta,
                               bn_rmean0)
    jax.block_until_ready(result["loss"])

    # Sanity check against a pure-JAX reference.
    z_ref, loss_ref, rmean_ref = _reference_forward(
        img, gt_label, conv_w, conv_b, bn_gamma, bn_beta, bn_rmean0)
    assert jnp.allclose(result["out"], z_ref, atol=1e-4, rtol=1e-4)
    assert jnp.allclose(result["loss"], loss_ref, atol=1e-2, rtol=1e-4)
    assert jnp.allclose(result["running_mean"], rmean_ref, atol=1e-4, rtol=1e-4)

    print("KERNEL_OK")
</pallas_src>

<mosaic_0001>
module attributes {stable_mosaic.version = 11 : i64} {
  func.func @kernel(%arg0: memref<6x256xf32, #tpu.memory_space<vmem>>, %arg1: memref<21xf32, #tpu.memory_space<smem>>, %arg2: memref<6x256xf32, #tpu.memory_space<vmem>>, %arg3: memref<6x256xf32, #tpu.memory_space<vmem>>, %arg4: memref<3xf32, #tpu.memory_space<smem>>, %arg5: memref<1xf32, #tpu.memory_space<smem>>) attributes {dimension_semantics = [], scalar_prefetch = 0 : i64, scratch_operands = 0 : i64, tpu.core_type = #tpu.core_type<tc>} {
    %c0 = arith.constant 0 : index
    %0 = memref.load %arg1[%c0] : memref<21xf32, #tpu.memory_space<smem>>
    %c1 = arith.constant 1 : index
    %1 = memref.load %arg1[%c1] : memref<21xf32, #tpu.memory_space<smem>>
    %c2 = arith.constant 2 : index
    %2 = memref.load %arg1[%c2] : memref<21xf32, #tpu.memory_space<smem>>
    %c3 = arith.constant 3 : index
    %3 = memref.load %arg1[%c3] : memref<21xf32, #tpu.memory_space<smem>>
    %c4 = arith.constant 4 : index
    %4 = memref.load %arg1[%c4] : memref<21xf32, #tpu.memory_space<smem>>
    %c5 = arith.constant 5 : index
    %5 = memref.load %arg1[%c5] : memref<21xf32, #tpu.memory_space<smem>>
    %c6 = arith.constant 6 : index
    %6 = memref.load %arg1[%c6] : memref<21xf32, #tpu.memory_space<smem>>
    %c7 = arith.constant 7 : index
    %7 = memref.load %arg1[%c7] : memref<21xf32, #tpu.memory_space<smem>>
    %c8 = arith.constant 8 : index
    %8 = memref.load %arg1[%c8] : memref<21xf32, #tpu.memory_space<smem>>
    %c9 = arith.constant 9 : index
    %9 = memref.load %arg1[%c9] : memref<21xf32, #tpu.memory_space<smem>>
    %c10 = arith.constant 10 : index
    %10 = memref.load %arg1[%c10] : memref<21xf32, #tpu.memory_space<smem>>
    %c11 = arith.constant 11 : index
    %11 = memref.load %arg1[%c11] : memref<21xf32, #tpu.memory_space<smem>>
    %c12 = arith.constant 12 : index
    %12 = memref.load %arg1[%c12] : memref<21xf32, #tpu.memory_space<smem>>
    %c13 = arith.constant 13 : index
    %13 = memref.load %arg1[%c13] : memref<21xf32, #tpu.memory_space<smem>>
    %c14 = arith.constant 14 : index
    %14 = memref.load %arg1[%c14] : memref<21xf32, #tpu.memory_space<smem>>
    %c15 = arith.constant 15 : index
    %15 = memref.load %arg1[%c15] : memref<21xf32, #tpu.memory_space<smem>>
    %c16 = arith.constant 16 : index
    %16 = memref.load %arg1[%c16] : memref<21xf32, #tpu.memory_space<smem>>
    %c17 = arith.constant 17 : index
    %17 = memref.load %arg1[%c17] : memref<21xf32, #tpu.memory_space<smem>>
    %c18 = arith.constant 18 : index
    %18 = memref.load %arg1[%c18] : memref<21xf32, #tpu.memory_space<smem>>
    %c19 = arith.constant 19 : index
    %19 = memref.load %arg1[%c19] : memref<21xf32, #tpu.memory_space<smem>>
    %c20 = arith.constant 20 : index
    %20 = memref.load %arg1[%c20] : memref<21xf32, #tpu.memory_space<smem>>
    %c0_0 = arith.constant 0 : index
    %c0_1 = arith.constant 0 : index
    %21 = vector.load %arg0[%c0_0, %c0_1] : memref<6x256xf32, #tpu.memory_space<vmem>>, vector<1x256xf32>
    %22 = vector.broadcast %0 : f32 to vector<1x256xf32>
    %23 = arith.mulf %22, %21 : vector<1x256xf32>
    %c1_2 = arith.constant 1 : index
    %c0_3 = arith.constant 0 : index
    %24 = vector.load %arg0[%c1_2, %c0_3] : memref<6x256xf32, #tpu.memory_space<vmem>>, vector<1x256xf32>
    %25 = vector.broadcast %1 : f32 to vector<1x256xf32>
    %26 = arith.mulf %25, %24 : vector<1x256xf32>
    %27 = arith.addf %23, %26 : vector<1x256xf32>
    %c2_4 = arith.constant 2 : index
    %c0_5 = arith.constant 0 : index
    %28 = vector.load %arg0[%c2_4, %c0_5] : memref<6x256xf32, #tpu.memory_space<vmem>>, vector<1x256xf32>
    %29 = vector.broadcast %2 : f32 to vector<1x256xf32>
    %30 = arith.mulf %29, %28 : vector<1x256xf32>
    %31 = arith.addf %27, %30 : vector<1x256xf32>
    %c0_6 = arith.constant 0 : index
    %c0_7 = arith.constant 0 : index
    %32 = vector.load %arg0[%c0_6, %c0_7] : memref<6x256xf32, #tpu.memory_space<vmem>>, vector<1x256xf32>
    %33 = vector.broadcast %3 : f32 to vector<1x256xf32>
    %34 = arith.mulf %33, %32 : vector<1x256xf32>
    %c1_8 = arith.constant 1 : index
    %c0_9 = arith.constant 0 : index
    %35 = vector.load %arg0[%c1_8, %c0_9] : memref<6x256xf32, #tpu.memory_space<vmem>>, vector<1x256xf32>
    %36 = vector.broadcast %4 : f32 to vector<1x256xf32>
    %37 = arith.mulf %36, %35 : vector<1x256xf32>
    %38 = arith.addf %34, %37 : vector<1x256xf32>
    %c2_10 = arith.constant 2 : index
    %c0_11 = arith.constant 0 : index
    %39 = vector.load %arg0[%c2_10, %c0_11] : memref<6x256xf32, #tpu.memory_space<vmem>>, vector<1x256xf32>
    %40 = vector.broadcast %5 : f32 to vector<1x256xf32>
    %41 = arith.mulf %40, %39 : vector<1x256xf32>
    %42 = arith.addf %38, %41 : vector<1x256xf32>
    %c0_12 = arith.constant 0 : index
    %c0_13 = arith.constant 0 : index
    %43 = vector.load %arg0[%c0_12, %c0_13] : memref<6x256xf32, #tpu.memory_space<vmem>>, vector<1x256xf32>
    %44 = vector.broadcast %6 : f32 to vector<1x256xf32>
    %45 = arith.mulf %44, %43 : vector<1x256xf32>
    %c1_14 = arith.constant 1 : index
    %c0_15 = arith.constant 0 : index
    %46 = vector.load %arg0[%c1_14, %c0_15] : memref<6x256xf32, #tpu.memory_space<vmem>>, vector<1x256xf32>
    %47 = vector.broadcast %7 : f32 to vector<1x256xf32>
    %48 = arith.mulf %47, %46 : vector<1x256xf32>
    %49 = arith.addf %45, %48 : vector<1x256xf32>
    %c2_16 = arith.constant 2 : index
    %c0_17 = arith.constant 0 : index
    %50 = vector.load %arg0[%c2_16, %c0_17] : memref<6x256xf32, #tpu.memory_space<vmem>>, vector<1x256xf32>
    %51 = vector.broadcast %8 : f32 to vector<1x256xf32>
    %52 = arith.mulf %51, %50 : vector<1x256xf32>
    %53 = arith.addf %49, %52 : vector<1x256xf32>
    %c3_18 = arith.constant 3 : index
    %c0_19 = arith.constant 0 : index
    %54 = vector.load %arg0[%c3_18, %c0_19] : memref<6x256xf32, #tpu.memory_space<vmem>>, vector<1x256xf32>
    %55 = vector.broadcast %0 : f32 to vector<1x256xf32>
    %56 = arith.mulf %55, %54 : vector<1x256xf32>
    %c4_20 = arith.constant 4 : index
    %c0_21 = arith.constant 0 : index
    %57 = vector.load %arg0[%c4_20, %c0_21] : memref<6x256xf32, #tpu.memory_space<vmem>>, vector<1x256xf32>
    %58 = vector.broadcast %1 : f32 to vector<1x256xf32>
    %59 = arith.mulf %58, %57 : vector<1x256xf32>
    %60 = arith.addf %56, %59 : vector<1x256xf32>
    %c5_22 = arith.constant 5 : index
    %c0_23 = arith.constant 0 : index
    %61 = vector.load %arg0[%c5_22, %c0_23] : memref<6x256xf32, #tpu.memory_space<vmem>>, vector<1x256xf32>
    %62 = vector.broadcast %2 : f32 to vector<1x256xf32>
    %63 = arith.mulf %62, %61 : vector<1x256xf32>
    %64 = arith.addf %60, %63 : vector<1x256xf32>
    %c3_24 = arith.constant 3 : index
    %c0_25 = arith.constant 0 : index
    %65 = vector.load %arg0[%c3_24, %c0_25] : memref<6x256xf32, #tpu.memory_space<vmem>>, vector<1x256xf32>
    %66 = vector.broadcast %3 : f32 to vector<1x256xf32>
    %67 = arith.mulf %66, %65 : vector<1x256xf32>
    %c4_26 = arith.constant 4 : index
    %c0_27 = arith.constant 0 : index
    %68 = vector.load %arg0[%c4_26, %c0_27] : memref<6x256xf32, #tpu.memory_space<vmem>>, vector<1x256xf32>
    %69 = vector.broadcast %4 : f32 to vector<1x256xf32>
    %70 = arith.mulf %69, %68 : vector<1x256xf32>
    %71 = arith.addf %67, %70 : vector<1x256xf32>
    %c5_28 = arith.constant 5 : index
    %c0_29 = arith.constant 0 : index
    %72 = vector.load %arg0[%c5_28, %c0_29] : memref<6x256xf32, #tpu.memory_space<vmem>>, vector<1x256xf32>
    %73 = vector.broadcast %5 : f32 to vector<1x256xf32>
    %74 = arith.mulf %73, %72 : vector<1x256xf32>
    %75 = arith.addf %71, %74 : vector<1x256xf32>
    %c3_30 = arith.constant 3 : index
    %c0_31 = arith.constant 0 : index
    %76 = vector.load %arg0[%c3_30, %c0_31] : memref<6x256xf32, #tpu.memory_space<vmem>>, vector<1x256xf32>
    %77 = vector.broadcast %6 : f32 to vector<1x256xf32>
    %78 = arith.mulf %77, %76 : vector<1x256xf32>
    %c4_32 = arith.constant 4 : index
    %c0_33 = arith.constant 0 : index
    %79 = vector.load %arg0[%c4_32, %c0_33] : memref<6x256xf32, #tpu.memory_space<vmem>>, vector<1x256xf32>
    %80 = vector.broadcast %7 : f32 to vector<1x256xf32>
    %81 = arith.mulf %80, %79 : vector<1x256xf32>
    %82 = arith.addf %78, %81 : vector<1x256xf32>
    %c5_34 = arith.constant 5 : index
    %c0_35 = arith.constant 0 : index
    %83 = vector.load %arg0[%c5_34, %c0_35] : memref<6x256xf32, #tpu.memory_space<vmem>>, vector<1x256xf32>
    %84 = vector.broadcast %8 : f32 to vector<1x256xf32>
    %85 = arith.mulf %84, %83 : vector<1x256xf32>
    %86 = arith.addf %82, %85 : vector<1x256xf32>
    %cst = arith.constant 0.000000e+00 : f32
    %87 = vector.broadcast %cst : f32 to vector<1x256xf32>
    %cst_36 = arith.constant dense<0.000000e+00> : vector<1xf32>
    %88 = vector.multi_reduction <add>, %31, %cst_36 [1] : vector<1x256xf32> to vector<1xf32>
    %89 = vector.shape_cast %88 : vector<1xf32> to vector<1x1xf32>
    %90 = arith.mulf %31, %31 : vector<1x256xf32>
    %cst_37 = arith.constant dense<0.000000e+00> : vector<1xf32>
    %91 = vector.multi_reduction <add>, %90, %cst_37 [1] : vector<1x256xf32> to vector<1xf32>
    %92 = vector.shape_cast %91 : vector<1xf32> to vector<1x1xf32>
    %93 = vector.shape_cast %31 : vector<1x256xf32> to vector<1x1x256xf32>
    %cst_38 = arith.constant dense<0.000000e+00> : vector<1xf32>
    %94 = vector.multi_reduction <add>, %93, %cst_38 [1, 2] : vector<1x1x256xf32> to vector<1xf32>
    %95 = vector.shape_cast %94 : vector<1xf32> to vector<1x1x1xf32>
    %96 = vector.extract %95[0, 0, 0] : f32 from vector<1x1x1xf32>
    %cst_39 = arith.constant dense<0.000000e+00> : vector<1xf32>
    %97 = vector.multi_reduction <add>, %64, %cst_39 [1] : vector<1x256xf32> to vector<1xf32>
    %98 = vector.shape_cast %97 : vector<1xf32> to vector<1x1xf32>
    %99 = arith.addf %89, %98 : vector<1x1xf32>
    %100 = arith.mulf %64, %64 : vector<1x256xf32>
    %cst_40 = arith.constant dense<0.000000e+00> : vector<1xf32>
    %101 = vector.multi_reduction <add>, %100, %cst_40 [1] : vector<1x256xf32> to vector<1xf32>
    %102 = vector.shape_cast %101 : vector<1xf32> to vector<1x1xf32>
    %103 = arith.addf %92, %102 : vector<1x1xf32>
    %104 = vector.shape_cast %64 : vector<1x256xf32> to vector<1x1x256xf32>
    %cst_41 = arith.constant dense<0.000000e+00> : vector<1xf32>
    %105 = vector.multi_reduction <add>, %104, %cst_41 [1, 2] : vector<1x1x256xf32> to vector<1xf32>
    %106 = vector.shape_cast %105 : vector<1xf32> to vector<1x1x1xf32>
    %107 = vector.extract %106[0, 0, 0] : f32 from vector<1x1x1xf32>
    %108 = arith.addf %96, %107 : f32
    %cst_42 = arith.constant 0.001953125 : f32
    %109 = vector.broadcast %cst_42 : f32 to vector<1x1xf32>
    %110 = arith.mulf %99, %109 : vector<1x1xf32>
    %cst_43 = arith.constant 0.001953125 : f32
    %111 = vector.broadcast %cst_43 : f32 to vector<1x1xf32>
    %112 = arith.mulf %103, %111 : vector<1x1xf32>
    %113 = arith.mulf %110, %110 : vector<1x1xf32>
    %114 = arith.subf %112, %113 : vector<1x1xf32>
    %cst_44 = arith.constant 0.000000e+00 : f32
    %115 = vector.broadcast %cst_44 : f32 to vector<1x1xf32>
    %116 = arith.maximumf %114, %115 : vector<1x1xf32>
    %cst_45 = arith.constant 9.99999974E-6 : f32
    %117 = vector.broadcast %cst_45 : f32 to vector<1x1xf32>
    %118 = arith.addf %116, %117 : vector<1x1xf32>
    %119 = math.rsqrt %118 : vector<1x1xf32>
    %120 = vector.broadcast %12 : f32 to vector<1x1xf32>
    %121 = arith.mulf %120, %119 : vector<1x1xf32>
    %122 = arith.mulf %110, %121 : vector<1x1xf32>
    %123 = vector.broadcast %15 : f32 to vector<1x1xf32>
    %124 = arith.subf %123, %122 : vector<1x1xf32>
    %125 = vector.broadcast %121 : vector<1x1xf32> to vector<1x256xf32>
    %126 = arith.mulf %31, %125 : vector<1x256xf32>
    %127 = vector.broadcast %124 : vector<1x1xf32> to vector<1x256xf32>
    %128 = arith.addf %126, %127 : vector<1x256xf32>
    %cst_46 = arith.constant 0.000000e+00 : f32
    %129 = vector.broadcast %cst_46 : f32 to vector<1x256xf32>
    %130 = arith.maximumf %128, %129 : vector<1x256xf32>
    %cst_47 = arith.constant 6.000000e+00 : f32
    %131 = vector.broadcast %cst_47 : f32 to vector<1x256xf32>
    %132 = arith.minimumf %130, %131 : vector<1x256xf32>
    %c0_48 = arith.constant 0 : index
    %c0_49 = arith.constant 0 : index
    %133 = vector.load %arg3[%c0_48, %c0_49] : memref<6x256xf32, #tpu.memory_space<vmem>>, vector<1x256xf32>
    tpu.vector_store %arg3[%c0_48, %c0_49], %132 {strides = array<i32>} : memref<6x256xf32, #tpu.memory_space<vmem>>, vector<1x256xf32>,
    %c0_50 = arith.constant 0 : index
    %c0_51 = arith.constant 0 : index
    %134 = vector.load %arg2[%c0_50, %c0_51] : memref<6x256xf32, #tpu.memory_space<vmem>>, vector<1x256xf32>
    %135 = arith.subf %132, %134 : vector<1x256xf32>
    %136 = arith.mulf %135, %135 : vector<1x256xf32>
    %137 = arith.addf %87, %136 : vector<1x256xf32>
    %138 = vector.broadcast %121 : vector<1x1xf32> to vector<1x256xf32>
    %139 = arith.mulf %64, %138 : vector<1x256xf32>
    %140 = vector.broadcast %124 : vector<1x1xf32> to vector<1x256xf32>
    %141 = arith.addf %139, %140 : vector<1x256xf32>
    %cst_52 = arith.constant 0.000000e+00 : f32
    %142 = vector.broadcast %cst_52 : f32 to vector<1x256xf32>
    %143 = arith.maximumf %141, %142 : vector<1x256xf32>
    %cst_53 = arith.constant 6.000000e+00 : f32
    %144 = vector.broadcast %cst_53 : f32 to vector<1x256xf32>
    %145 = arith.minimumf %143, %144 : vector<1x256xf32>
    %c3_54 = arith.constant 3 : index
    %c0_55 = arith.constant 0 : index
    %146 = vector.load %arg3[%c3_54, %c0_55] : memref<6x256xf32, #tpu.memory_space<vmem>>, vector<1x256xf32>
    tpu.vector_store %arg3[%c3_54, %c0_55], %145 {strides = array<i32>} : memref<6x256xf32, #tpu.memory_space<vmem>>, vector<1x256xf32>,
    %c3_56 = arith.constant 3 : index
    %c0_57 = arith.constant 0 : index
    %147 = vector.load %arg2[%c3_56, %c0_57] : memref<6x256xf32, #tpu.memory_space<vmem>>, vector<1x256xf32>
    %148 = arith.subf %145, %147 : vector<1x256xf32>
    %149 = arith.mulf %148, %148 : vector<1x256xf32>
    %150 = arith.addf %137, %149 : vector<1x256xf32>
    %cst_58 = arith.constant 0.001953125 : f32
    %151 = arith.mulf %108, %cst_58 : f32
    %152 = arith.addf %151, %9 : f32
    %cst_59 = arith.constant 0.899999976 : f32
    %153 = arith.mulf %cst_59, %18 : f32
    %cst_60 = arith.constant 1.000000e-01 : f32
    %154 = arith.mulf %cst_60, %152 : f32
    %155 = arith.addf %153, %154 : f32
    %c0_61 = arith.constant 0 : index
    %156 = memref.load %arg4[%c0_61] : memref<3xf32, #tpu.memory_space<smem>>
    memref.store %155, %arg4[%c0_61] : memref<3xf32, #tpu.memory_space<smem>>
    %cst_62 = arith.constant dense<0.000000e+00> : vector<1xf32>
    %157 = vector.multi_reduction <add>, %42, %cst_62 [1] : vector<1x256xf32> to vector<1xf32>
    %158 = vector.shape_cast %157 : vector<1xf32> to vector<1x1xf32>
    %159 = arith.mulf %42, %42 : vector<1x256xf32>
    %cst_63 = arith.constant dense<0.000000e+00> : vector<1xf32>
    %160 = vector.multi_reduction <add>, %159, %cst_63 [1] : vector<1x256xf32> to vector<1xf32>
    %161 = vector.shape_cast %160 : vector<1xf32> to vector<1x1xf32>
    %162 = vector.shape_cast %42 : vector<1x256xf32> to vector<1x1x256xf32>
    %cst_64 = arith.constant dense<0.000000e+00> : vector<1xf32>
    %163 = vector.multi_reduction <add>, %162, %cst_64 [1, 2] : vector<1x1x256xf32> to vector<1xf32>
    %164 = vector.shape_cast %163 : vector<1xf32> to vector<1x1x1xf32>
    %165 = vector.extract %164[0, 0, 0] : f32 from vector<1x1x1xf32>
    %cst_65 = arith.constant dense<0.000000e+00> : vector<1xf32>
    %166 = vector.multi_reduction <add>, %75, %cst_65 [1] : vector<1x256xf32> to vector<1xf32>
    %167 = vector.shape_cast %166 : vector<1xf32> to vector<1x1xf32>
    %168 = arith.addf %158, %167 : vector<1x1xf32>
    %169 = arith.mulf %75, %75 : vector<1x256xf32>
    %cst_66 = arith.constant dense<0.000000e+00> : vector<1xf32>
    %170 = vector.multi_reduction <add>, %169, %cst_66 [1] : vector<1x256xf32> to vector<1xf32>
    %171 = vector.shape_cast %170 : vector<1xf32> to vector<1x1xf32>
    %172 = arith.addf %161, %171 : vector<1x1xf32>
    %173 = vector.shape_cast %75 : vector<1x256xf32> to vector<1x1x256xf32>
    %cst_67 = arith.constant dense<0.000000e+00> : vector<1xf32>
    %174 = vector.multi_reduction <add>, %173, %cst_67 [1, 2] : vector<1x1x256xf32> to vector<1xf32>
    %175 = vector.shape_cast %174 : vector<1xf32> to vector<1x1x1xf32>
    %176 = vector.extract %175[0, 0, 0] : f32 from vector<1x1x1xf32>
    %177 = arith.addf %165, %176 : f32
    %cst_68 = arith.constant 0.001953125 : f32
    %178 = vector.broadcast %cst_68 : f32 to vector<1x1xf32>
    %179 = arith.mulf %168, %178 : vector<1x1xf32>
    %cst_69 = arith.constant 0.001953125 : f32
    %180 = vector.broadcast %cst_69 : f32 to vector<1x1xf32>
    %181 = arith.mulf %172, %180 : vector<1x1xf32>
    %182 = arith.mulf %179, %179 : vector<1x1xf32>
    %183 = arith.subf %181, %182 : vector<1x1xf32>
    %cst_70 = arith.constant 0.000000e+00 : f32
    %184 = vector.broadcast %cst_70 : f32 to vector<1x1xf32>
    %185 = arith.maximumf %183, %184 : vector<1x1xf32>
    %cst_71 = arith.constant 9.99999974E-6 : f32
    %186 = vector.broadcast %cst_71 : f32 to vector<1x1xf32>
    %187 = arith.addf %185, %186 : vector<1x1xf32>
    %188 = math.rsqrt %187 : vector<1x1xf32>
    %189 = vector.broadcast %13 : f32 to vector<1x1xf32>
    %190 = arith.mulf %189, %188 : vector<1x1xf32>
    %191 = arith.mulf %179, %190 : vector<1x1xf32>
    %192 = vector.broadcast %16 : f32 to vector<1x1xf32>
    %193 = arith.subf %192, %191 : vector<1x1xf32>
    %194 = vector.broadcast %190 : vector<1x1xf32> to vector<1x256xf32>
    %195 = arith.mulf %42, %194 : vector<1x256xf32>
    %196 = vector.broadcast %193 : vector<1x1xf32> to vector<1x256xf32>
    %197 = arith.addf %195, %196 : vector<1x256xf32>
    %cst_72 = arith.constant 0.000000e+00 : f32
    %198 = vector.broadcast %cst_72 : f32 to vector<1x256xf32>
    %199 = arith.maximumf %197, %198 : vector<1x256xf32>
    %cst_73 = arith.constant 6.000000e+00 : f32
    %200 = vector.broadcast %cst_73 : f32 to vector<1x256xf32>
    %201 = arith.minimumf %199, %200 : vector<1x256xf32>
    %c1_74 = arith.constant 1 : index
    %c0_75 = arith.constant 0 : index
    %202 = vector.load %arg3[%c1_74, %c0_75] : memref<6x256xf32, #tpu.memory_space<vmem>>, vector<1x256xf32>
    tpu.vector_store %arg3[%c1_74, %c0_75], %201 {strides = array<i32>} : memref<6x256xf32, #tpu.memory_space<vmem>>, vector<1x256xf32>,
    %c1_76 = arith.constant 1 : index
    %c0_77 = arith.constant 0 : index
    %203 = vector.load %arg2[%c1_76, %c0_77] : memref<6x256xf32, #tpu.memory_space<vmem>>, vector<1x256xf32>
    %204 = arith.subf %201, %203 : vector<1x256xf32>
    %205 = arith.mulf %204, %204 : vector<1x256xf32>
    %206 = arith.addf %150, %205 : vector<1x256xf32>
    %207 = vector.broadcast %190 : vector<1x1xf32> to vector<1x256xf32>
    %208 = arith.mulf %75, %207 : vector<1x256xf32>
    %209 = vector.broadcast %193 : vector<1x1xf32> to vector<1x256xf32>
    %210 = arith.addf %208, %209 : vector<1x256xf32>
    %cst_78 = arith.constant 0.000000e+00 : f32
    %211 = vector.broadcast %cst_78 : f32 to vector<1x256xf32>
    %212 = arith.maximumf %210, %211 : vector<1x256xf32>
    %cst_79 = arith.constant 6.000000e+00 : f32
    %213 = vector.broadcast %cst_79 : f32 to vector<1x256xf32>
    %214 = arith.minimumf %212, %213 : vector<1x256xf32>
    %c4_80 = arith.constant 4 : index
    %c0_81 = arith.constant 0 : index
    %215 = vector.load %arg3[%c4_80, %c0_81] : memref<6x256xf32, #tpu.memory_space<vmem>>, vector<1x256xf32>
    tpu.vector_store %arg3[%c4_80, %c0_81], %214 {strides = array<i32>} : memref<6x256xf32, #tpu.memory_space<vmem>>, vector<1x256xf32>,
    %c4_82 = arith.constant 4 : index
    %c0_83 = arith.constant 0 : index
    %216 = vector.load %arg2[%c4_82, %c0_83] : memref<6x256xf32, #tpu.memory_space<vmem>>, vector<1x256xf32>
    %217 = arith.subf %214, %216 : vector<1x256xf32>
    %218 = arith.mulf %217, %217 : vector<1x256xf32>
    %219 = arith.addf %206, %218 : vector<1x256xf32>
    %cst_84 = arith.constant 0.001953125 : f32
    %220 = arith.mulf %177, %cst_84 : f32
    %221 = arith.addf %220, %10 : f32
    %cst_85 = arith.constant 0.899999976 : f32
    %222 = arith.mulf %cst_85, %19 : f32
    %cst_86 = arith.constant 1.000000e-01 : f32
    %223 = arith.mulf %cst_86, %221 : f32
    %224 = arith.addf %222, %223 : f32
    %c1_87 = arith.constant 1 : index
    %225 = memref.load %arg4[%c1_87] : memref<3xf32, #tpu.memory_space<smem>>
    memref.store %224, %arg4[%c1_87] : memref<3xf32, #tpu.memory_space<smem>>
    %cst_88 = arith.constant dense<0.000000e+00> : vector<1xf32>
    %226 = vector.multi_reduction <add>, %53, %cst_88 [1] : vector<1x256xf32> to vector<1xf32>
    %227 = vector.shape_cast %226 : vector<1xf32> to vector<1x1xf32>
    %228 = arith.mulf %53, %53 : vector<1x256xf32>
    %cst_89 = arith.constant dense<0.000000e+00> : vector<1xf32>
    %229 = vector.multi_reduction <add>, %228, %cst_89 [1] : vector<1x256xf32> to vector<1xf32>
    %230 = vector.shape_cast %229 : vector<1xf32> to vector<1x1xf32>
    %231 = vector.shape_cast %53 : vector<1x256xf32> to vector<1x1x256xf32>
    %cst_90 = arith.constant dense<0.000000e+00> : vector<1xf32>
    %232 = vector.multi_reduction <add>, %231, %cst_90 [1, 2] : vector<1x1x256xf32> to vector<1xf32>
    %233 = vector.shape_cast %232 : vector<1xf32> to vector<1x1x1xf32>
    %234 = vector.extract %233[0, 0, 0] : f32 from vector<1x1x1xf32>
    %cst_91 = arith.constant dense<0.000000e+00> : vector<1xf32>
    %235 = vector.multi_reduction <add>, %86, %cst_91 [1] : vector<1x256xf32> to vector<1xf32>
    %236 = vector.shape_cast %235 : vector<1xf32> to vector<1x1xf32>
    %237 = arith.addf %227, %236 : vector<1x1xf32>
    %238 = arith.mulf %86, %86 : vector<1x256xf32>
    %cst_92 = arith.constant dense<0.000000e+00> : vector<1xf32>
    %239 = vector.multi_reduction <add>, %238, %cst_92 [1] : vector<1x256xf32> to vector<1xf32>
    %240 = vector.shape_cast %239 : vector<1xf32> to vector<1x1xf32>
    %241 = arith.addf %230, %240 : vector<1x1xf32>
    %242 = vector.shape_cast %86 : vector<1x256xf32> to vector<1x1x256xf32>
    %cst_93 = arith.constant dense<0.000000e+00> : vector<1xf32>
    %243 = vector.multi_reduction <add>, %242, %cst_93 [1, 2] : vector<1x1x256xf32> to vector<1xf32>
    %244 = vector.shape_cast %243 : vector<1xf32> to vector<1x1x1xf32>
    %245 = vector.extract %244[0, 0, 0] : f32 from vector<1x1x1xf32>
    %246 = arith.addf %234, %245 : f32
    %cst_94 = arith.constant 0.001953125 : f32
    %247 = vector.broadcast %cst_94 : f32 to vector<1x1xf32>
    %248 = arith.mulf %237, %247 : vector<1x1xf32>
    %cst_95 = arith.constant 0.001953125 : f32
    %249 = vector.broadcast %cst_95 : f32 to vector<1x1xf32>
    %250 = arith.mulf %241, %249 : vector<1x1xf32>
    %251 = arith.mulf %248, %248 : vector<1x1xf32>
    %252 = arith.subf %250, %251 : vector<1x1xf32>
    %cst_96 = arith.constant 0.000000e+00 : f32
    %253 = vector.broadcast %cst_96 : f32 to vector<1x1xf32>
    %254 = arith.maximumf %252, %253 : vector<1x1xf32>
    %cst_97 = arith.constant 9.99999974E-6 : f32
    %255 = vector.broadcast %cst_97 : f32 to vector<1x1xf32>
    %256 = arith.addf %254, %255 : vector<1x1xf32>
    %257 = math.rsqrt %256 : vector<1x1xf32>
    %258 = vector.broadcast %14 : f32 to vector<1x1xf32>
    %259 = arith.mulf %258, %257 : vector<1x1xf32>
    %260 = arith.mulf %248, %259 : vector<1x1xf32>
    %261 = vector.broadcast %17 : f32 to vector<1x1xf32>
    %262 = arith.subf %261, %260 : vector<1x1xf32>
    %263 = vector.broadcast %259 : vector<1x1xf32> to vector<1x256xf32>
    %264 = arith.mulf %53, %263 : vector<1x256xf32>
    %265 = vector.broadcast %262 : vector<1x1xf32> to vector<1x256xf32>
    %266 = arith.addf %264, %265 : vector<1x256xf32>
    %cst_98 = arith.constant 0.000000e+00 : f32
    %267 = vector.broadcast %cst_98 : f32 to vector<1x256xf32>
    %268 = arith.maximumf %266, %267 : vector<1x256xf32>
    %cst_99 = arith.constant 6.000000e+00 : f32
    %269 = vector.broadcast %cst_99 : f32 to vector<1x256xf32>
    %270 = arith.minimumf %268, %269 : vector<1x256xf32>
    %c2_100 = arith.constant 2 : index
    %c0_101 = arith.constant 0 : index
    %271 = vector.load %arg3[%c2_100, %c0_101] : memref<6x256xf32, #tpu.memory_space<vmem>>, vector<1x256xf32>
    tpu.vector_store %arg3[%c2_100, %c0_101], %270 {strides = array<i32>} : memref<6x256xf32, #tpu.memory_space<vmem>>, vector<1x256xf32>,
    %c2_102 = arith.constant 2 : index
    %c0_103 = arith.constant 0 : index
    %272 = vector.load %arg2[%c2_102, %c0_103] : memref<6x256xf32, #tpu.memory_space<vmem>>, vector<1x256xf32>
    %273 = arith.subf %270, %272 : vector<1x256xf32>
    %274 = arith.mulf %273, %273 : vector<1x256xf32>
    %275 = arith.addf %219, %274 : vector<1x256xf32>
    %276 = vector.broadcast %259 : vector<1x1xf32> to vector<1x256xf32>
    %277 = arith.mulf %86, %276 : vector<1x256xf32>
    %278 = vector.broadcast %262 : vector<1x1xf32> to vector<1x256xf32>
    %279 = arith.addf %277, %278 : vector<1x256xf32>
    %cst_104 = arith.constant 0.000000e+00 : f32
    %280 = vector.broadcast %cst_104 : f32 to vector<1x256xf32>
    %281 = arith.maximumf %279, %280 : vector<1x256xf32>
    %cst_105 = arith.constant 6.000000e+00 : f32
    %282 = vector.broadcast %cst_105 : f32 to vector<1x256xf32>
    %283 = arith.minimumf %281, %282 : vector<1x256xf32>
    %c5_106 = arith.constant 5 : index
    %c0_107 = arith.constant 0 : index
    %284 = vector.load %arg3[%c5_106, %c0_107] : memref<6x256xf32, #tpu.memory_space<vmem>>, vector<1x256xf32>
    tpu.vector_store %arg3[%c5_106, %c0_107], %283 {strides = array<i32>} : memref<6x256xf32, #tpu.memory_space<vmem>>, vector<1x256xf32>,
    %c5_108 = arith.constant 5 : index
    %c0_109 = arith.constant 0 : index
    %285 = vector.load %arg2[%c5_108, %c0_109] : memref<6x256xf32, #tpu.memory_space<vmem>>, vector<1x256xf32>
    %286 = arith.subf %283, %285 : vector<1x256xf32>
    %287 = arith.mulf %286, %286 : vector<1x256xf32>
    %288 = arith.addf %275, %287 : vector<1x256xf32>
    %cst_110 = arith.constant 0.001953125 : f32
    %289 = arith.mulf %246, %cst_110 : f32
    %290 = arith.addf %289, %11 : f32
    %cst_111 = arith.constant 0.899999976 : f32
    %291 = arith.mulf %cst_111, %20 : f32
    %cst_112 = arith.constant 1.000000e-01 : f32
    %292 = arith.mulf %cst_112, %290 : f32
    %293 = arith.addf %291, %292 : f32
    %c2_113 = arith.constant 2 : index
    %294 = memref.load %arg4[%c2_113] : memref<3xf32, #tpu.memory_space<smem>>
    memref.store %293, %arg4[%c2_113] : memref<3xf32, #tpu.memory_space<smem>>
    %295 = vector.shape_cast %288 : vector<1x256xf32> to vector<1x1x256xf32>
    %cst_114 = arith.constant dense<0.000000e+00> : vector<1xf32>
    %296 = vector.multi_reduction <add>, %295, %cst_114 [1, 2] : vector<1x1x256xf32> to vector<1xf32>
    %297 = vector.shape_cast %296 : vector<1xf32> to vector<1x1x1xf32>
    %298 = vector.extract %297[0, 0, 0] : f32 from vector<1x1x1xf32>
    %c0_115 = arith.constant 0 : index
    %299 = memref.load %arg5[%c0_115] : memref<1xf32, #tpu.memory_space<smem>>
    memref.store %298, %arg5[%c0_115] : memref<1xf32, #tpu.memory_space<smem>>
    return
  }
}

</mosaic_0001>

<bundles_post_ra>
// kernel: tpu_custom_call.1
= control target key start
LH: loop header
LB: loop body
LE: loop exit
PB: predicated region body
PF: predicated region fallthrough
CT: control target
= control target key end

     0   :  { %11 = vsyncpa [#allocation3], 0  ;;  %s1033_s0 = inlined_call_operand.hbm [shape: f32[6,256], index: 0, kind: input, shape index: {}]   ;;  %s1034_s1 = inlined_call_operand.vmem [shape: f32[21], index: 1, kind: input, shape index: {}]   ;;  %s1035_s2 = inlined_call_operand.hbm [shape: f32[6,256], index: 2, kind: input, shape index: {}]   ;;  %s1036_s3 = inlined_call_operand.hbm [shape: f32[6,256], index: 3, kind: output, shape index: {0}]   ;;  %s1037_s4 = inlined_call_operand.hbm [shape: f32[3], index: 4, kind: output, shape index: {1}]   ;;  %s1038_s5 = inlined_call_operand.hbm [shape: f32[1], index: 5, kind: output, shape index: {2}]  }
   0x1   :  { %12 = vsyncpa [#allocation6], 0 }
   0x2   :  { %13 = vsyncpa [#allocation9], 0 }
   0x3   :  { %14 = vsyncpa [#allocation4], 0 }
   0x4   :  { %15 = vsyncpa [#allocation5], 0 }
   0x5   :  { %16 = vsyncpa [#allocation13], 0  ;;  %s33_s20 = sshll.u32 %s1034_s1, 4  ;;  %s768_s21 = smov [#allocation2]   ;;  %s34_s20 = int_to_ptr.vmem [resolvable:$true] %s33_s20 }
   0x6   :  { %s23_s22 = sshll.u32 %s768_s21, 4  ;;  %s658_s25 = scalar_lea.hbm %s1033_s0, 256  ;;  %s24_s22 = int_to_ptr.vmem [resolvable:$true] %s23_s22 }
   0x7   :  { %p659_p0 = scmp.ne.s32.totalorder %s1033_s0, %s658_s25  ;;  %p662_p1 = scmp.lt.u32.totalorder %s658_s25, %s1033_s0 }
   0x9   :  { %p664_p2 = pnand %p662_p1, %p659_p0 }
   0xb   :  { %667 = shalt.err (!%p664_p2)
}
   0xc   :  { %s668_s30 = scalar_lea.vmem %s24_s22, 256  ;;  %p673_p4 = scmp.lt.s32.totalorder %s24_s22, %s24_s22 }
   0xd   :  { %p669_p3 = scmp.ne.s32.totalorder %s24_s22, %s668_s30  ;;  %p674_p5 = scmp.lt.s32.totalorder %s668_s30, %s668_s30 }
   0xf   :  { %p675_p6 = por %p674_p5, %p673_p4 }
  0x11   :  { %p676_p7 = pnand %p675_p6, %p669_p3 }
  0x13   :  { %679 = shalt.err (!%p676_p7)
}
  0x14   :  { %26 = dma.hbm_to_vmem [thread:$0]  %s1033_s0, 256, %s24_s22, [#allocation3]  }
  0x15   :  { %s680_s7 = scalar_lea.vmem %s34_s20, 16  ;;  %p685_p9 = scmp.lt.s32.totalorder %s34_s20, %s34_s20 }
  0x16   :  { %p681_p8 = scmp.ne.s32.totalorder %s34_s20, %s680_s7  ;;  %p686_p10 = scmp.lt.s32.totalorder %s680_s7, %s680_s7 }
  0x18   :  { %p687_p11 = por %p686_p10, %p685_p9 }
  0x1a   :  { %p688_p12 = pnand %p687_p11, %p681_p8 }
  0x1c   :  { %691 = shalt.err (!%p688_p12)
}
  0x1d   :  { %s769_s8 = smov [#allocation7]   ;;  %s770_s9 = smov [#allocation8]  }
  0x1e   :  { %36 = dma.vmem_to_smem %s34_s20, 16, %s769_s8, [#allocation6]  }
  0x1f   :  { %s43_s10 = sshll.u32 %s770_s9, 4  ;;  %s692_s13 = scalar_lea.hbm %s1035_s2, 256  ;;  %s44_s10 = int_to_ptr.vmem [resolvable:$true] %s43_s10 }
  0x20   :  { %p693_p13 = scmp.ne.s32.totalorder %s1035_s2, %s692_s13  ;;  %p696_p0 = scmp.lt.u32.totalorder %s692_s13, %s1035_s2 }
  0x22   :  { %p698_p1 = pnand %p696_p0, %p693_p13 }
  0x24   :  { %701 = shalt.err (!%p698_p1)
}
  0x25   :  { %s702_s17 = scalar_lea.vmem %s44_s10, 256  ;;  %p707_p3 = scmp.lt.s32.totalorder %s44_s10, %s44_s10 }
  0x26   :  { %p703_p2 = scmp.ne.s32.totalorder %s44_s10, %s702_s17  ;;  %p708_p4 = scmp.lt.s32.totalorder %s702_s17, %s702_s17 }
  0x28   :  { %p709_p5 = por %p708_p4, %p707_p3 }
  0x2a   :  { %p710_p6 = pnand %p709_p5, %p703_p2 }
  0x2c   :  { %713 = shalt.err (!%p710_p6)
}
  0x2d   :  { %46 = dma.hbm_to_vmem [thread:$0]  %s1035_s2, 256, %s44_s10, [#allocation9]  }
  0x2e   :  { %756 = dma.done.wait [#allocation3], 256  }
  0x2f   :  { %757 = vsyncadd [#allocation3], 4294967040 }
  0x30   :  { %758 = dma.done.wait [#allocation6], 16  }
  0x31   :  { %759 = vsyncadd [#allocation6], 4294967280 }
  0x32   :  { %760 = dma.done.wait [#allocation9], 256  }
  0x33   :  { %761 = vsyncadd [#allocation9], 4294967040 }
  0x34   :  { %56 = sfence }
  0x35   :  { %s614_s20 = sld [smem:[#allocation7 + $0x3]]  ;;  %s615_s21 = sld [smem:[#allocation7 + $0x4]]  ;;  %v129_v0 = vlaneseq  ;;  %v108_v1 = vld [vmem:[#allocation2 + $0x3] ss:$8 sm:$0x3]  ;;  %vm139_vm0 = vcmask 1040384  }
  0x36   :  { %s831_s22 = sld [smem:[#allocation7 + $0x5]]  ;;  %s833_s23 = sld [smem:[#allocation7]]  ;;  %v111_v2 = vld [vmem:[#allocation2 + $0x4] ss:$8 sm:$0x3] }
  0x37   :  { %s835_s24 = sld [smem:[#allocation7 + $0x1]]  ;;  %v130_v3 = vshrl.u32 %v129_v0, 7  ;;  %s838_s2 = sld [smem:[#allocation7 + $0x2]]  ;;  %v115_v4 = vld [vmem:[#allocation2 + $0x5] ss:$8 sm:$0x3] }
  0x38   :  { %v78_v5 = vld [vmem:[#allocation2] ss:$8 sm:$0x3]  ;;  %v840_v8 = vld [vmem:[#allocation2 + $0x1] ss:$8 sm:$0x3] }
  0x39   :  { %s842_s25 = sld [smem:[#allocation7 + $0x6]]  ;;  %s845_s26 = sld [smem:[#allocation7 + $0x7]]  ;;  %v849_v13 = vsub.s32 0, %v130_v3  ;;  %v851_v14 = vld [vmem:[#allocation2 + $0x2] ss:$8 sm:$0x3] }
  0x3a   :  { %s847_s27 = sld [smem:[#allocation7 + $0x8]]  ;;  %v854_v18 = vsub.s32 1, %v130_v3  ;;  %s623_s28 = sld [smem:[#allocation7 + $0xc]]  ;;  %vm972_vm1 = vcmp.lt.s32.totalorder %v129_v0, 256 }
  0x3b   :  { %v91_v6 = vstv %s614_s20  ;;  %v93_v7 = vstv %s615_s21  ;;  %s626_s29 = sld [smem:[#allocation7 + $0xf]]  ;;  %s624_s30 = sld [smem:[#allocation7 + $0xd]] }
  0x3c   :  { %v96_v9 = vstv %s831_s22  ;;  %v118_v10 = vmul.f32 %v108_v1, %v91_v6  ;;  %v119_v11 = vmul.f32 %v111_v2, %v93_v7  ;;  %v92_v15 = vmul.f32 %v91_v6, %v78_v5  ;;  %s627_s1 = sld [smem:[#allocation7 + $0x10]]  ;;  %s625_s6 = sld [smem:[#allocation7 + $0xe]] }
  0x3d   :  { %v121_v12 = vmul.f32 %v115_v4, %v96_v9  ;;  %v94_v16 = vmul.f32 %v93_v7, %v840_v8  ;;  %v79_v19 = vstv %s833_s23  ;;  %v83_v20 = vstv %s835_s24  ;;  %s961_s7 = sld [smem:[#allocation7 + $0x11]]  ;;  %s629_s9 = sld [smem:[#allocation7 + $0x12]] }
  0x3e   :  { %v120_v17 = vadd.f32 %v119_v11, %v118_v10  ;;  %v80_v21 = vmul.f32 %v79_v19, %v78_v5  ;;  %v84_v22 = vmul.f32 %v83_v20, %v840_v8  ;;  %v88_v23 = vstv %s838_s2  ;;  %s620_s8 = sld [smem:[#allocation7 + $0x9]]  ;;  %s630_s13 = sld [smem:[#allocation7 + $0x13]] }
  0x3f   :  { %v97_v24 = vmul.f32 %v96_v9, %v851_v14  ;;  %v89_v26 = vmul.f32 %v88_v23, %v851_v14  ;;  %v109_v27 = vmul.f32 %v108_v1, %v79_v19  ;;  %v112_v28 = vmul.f32 %v111_v2, %v83_v20  ;;  %s621_s14 = sld [smem:[#allocation7 + $0xa]]  ;;  %s622_s21 = sld [smem:[#allocation7 + $0xb]] }
  0x40   :  { %v861_v25 = vadd.f32 %v121_v12, %v120_v17  ;;  %v85_v29 = vadd.f32 %v84_v22, %v80_v21  ;;  %v99_v30 = vstv %s842_s25  ;;  %v116_v31 = vmul.f32 %v115_v4, %v88_v23  ;;  %s631_s23 = sld [smem:[#allocation7 + $0x14]] }
  0x41   :  { %v95_v32 = vadd.f32 %v94_v16, %v92_v15  ;;  %v101_v35 = vstv %s845_s26  ;;  %v104_v36 = vstv %s847_s27  ;;  %v123_v38 = vmul.f32 %v108_v1, %v99_v30 }
  0x42   :  { %v313_v33 = vrot.slane %v861_v25, %v849_v13  ;;  %v317_v34 = vrot.slane %v861_v25, %v854_v18  ;;  %v871_v37 = vadd.f32 %v89_v26, %v85_v29  ;;  %v124_v39 = vmul.f32 %v111_v2, %v101_v35 }
  0x43   :  { %v126_v40 = vmul.f32 %v115_v4, %v104_v36  ;;  %v113_v43 = vadd.f32 %v112_v28, %v109_v27  ;;  %v875_v44 = vadd.f32 %v97_v24, %v95_v32  ;;  %v100_v56 = vmul.f32 %v99_v30, %v78_v5  ;;  %s264_s18 = smul.f32 0.9, %s629_s9 }
  0x44   :  { %v320_v41 = vsel %vm139_vm0, %v313_v33, 0.0  ;;  %v321_v42 = vsel %vm139_vm0, %v317_v34, 0.0  ;;  %v132_v46 = vrot.slane %v871_v37, %v849_v13  ;;  %v136_v47 = vrot.slane %v871_v37, %v854_v18  ;;  %s402_s2 = smul.f32 0.9, %s630_s13 }
  0x45   :  { %v322_v45 = vadd.f32 %v321_v42, %v320_v41  ;;  %v125_v48 = vadd.f32 %v124_v39, %v123_v38  ;;  %v881_v49 = vadd.f32 %v116_v31, %v113_v43  ;;  %v145_v50 = vmul.f32 %v871_v37, %v871_v37 }
  0x46   :  { %v273_v51 = vrot.slane %v875_v44, %v849_v13  ;;  %v277_v52 = vrot.slane %v875_v44, %v854_v18  ;;  %v140_v53 = vsel %vm139_vm0, %v132_v46, 0.0  ;;  %v141_v54 = vsel %vm139_vm0, %v136_v47, 0.0 }
  0x47   :  { %323 = vadd.xlane.f32.xlu1 %v322_v45  ;;  %v891_v55 = vadd.f32 %v126_v40, %v125_v48  ;;  %v142_v57 = vadd.f32 %v141_v54, %v140_v53  ;;  %v173_v58 = vrot.slane %v881_v49, %v849_v13  ;;  %v177_v59 = vrot.slane %v881_v49, %v854_v18 }
  0x48   :  { %v150_v60 = vrot.slane %v145_v50, %v849_v13  ;;  %v154_v63 = vrot.slane %v145_v50, %v854_v18  ;;  %v280_v1 = vsel %vm139_vm0, %v273_v51, 0.0  ;;  %v281_v5 = vsel %vm139_vm0, %v277_v52, 0.0 }
  0x49   :  { %v451_v61 = vrot.slane %v891_v55, %v849_v13  ;;  %v455_v62 = vrot.slane %v891_v55, %v854_v18  ;;  %143 = vadd.xlane.f32.xlu0 %v142_v57  ;;  %v180_v2 = vsel %vm139_vm0, %v173_v58, 0.0  ;;  %v181_v3 = vsel %vm139_vm0, %v177_v59, 0.0 }
  0x4a   :  { %v157_v4 = vsel %vm139_vm0, %v150_v60, 0.0  ;;  %v182_v9 = vadd.f32 %v181_v3, %v180_v2  ;;  %v158_v10 = vsel %vm139_vm0, %v154_v63, 0.0  ;;  %v282_v15 = vadd.f32 %v281_v5, %v280_v1 }
  0x4b   :  { %v458_v6 = vsel %vm139_vm0, %v451_v61, 0.0  ;;  %v459_v7 = vsel %vm139_vm0, %v455_v62, 0.0  ;;  %v159_v12 = vadd.f32 %v158_v10, %v157_v4  ;;  %v186_v16 = vmul.f32 %v881_v49, %v881_v49 }
  0x4c   :  { %v460_v11 = vadd.f32 %v459_v7, %v458_v6  ;;  %v102_v17 = vmul.f32 %v101_v35, %v840_v8  ;;  %v105_v19 = vmul.f32 %v104_v36, %v851_v14  ;;  %v326_v20 = vmul.f32 %v861_v25, %v861_v25 }
  0x4d   :  { %v285_v21 = vmul.f32 %v875_v44, %v875_v44  ;;  %183 = vadd.xlane.f32.xlu0 %v182_v9  ;;  %v191_v22 = vrot.slane %v186_v16, %v849_v13  ;;  %v195_v23 = vrot.slane %v186_v16, %v854_v18  ;;  %v464_v24 = vmul.f32 %v891_v55, %v891_v55 }
  0x4e   :  { %461 = vadd.xlane.f32.xlu1 %v460_v11  ;;  %v103_v26 = vadd.f32 %v102_v17, %v100_v56  ;;  %v331_v8 = vrot.slane %v326_v20, %v849_v13  ;;  %v335_v14 = vrot.slane %v326_v20, %v854_v18 }
  0x4f   :  { %v198_v27 = vsel %vm139_vm0, %v191_v22, 0.0  ;;  %v199_v28 = vsel %vm139_vm0, %v195_v23, 0.0  ;;  %v290_v30 = vrot.slane %v285_v21, %v849_v13  ;;  %v294_v31 = vrot.slane %v285_v21, %v854_v18 }
  0x50   :  { %v927_v29 = vadd.f32 %v105_v19, %v103_v26  ;;  %v200_v32 = vadd.f32 %v199_v28, %v198_v27  ;;  %v338_v33 = vsel %vm139_vm0, %v331_v8, 0.0  ;;  %v469_v34 = vrot.slane %v464_v24, %v849_v13 }
  0x51   :  { %283 = vadd.xlane.f32.xlu0 %v282_v15  ;;  %v339_v38 = vsel %vm139_vm0, %v335_v14, 0.0  ;;  %v473_v39 = vrot.slane %v464_v24, %v854_v18  ;;  %v297_v43 = vsel %vm139_vm0, %v290_v30, 0.0  ;;  %v298_v45 = vsel %vm139_vm0, %v294_v31, 0.0 }
  0x52   :  { %160 = vadd.xlane.f32.xlu1 %v159_v12  ;;  %v411_v35 = vrot.slane %v927_v29, %v849_v13  ;;  %v415_v36 = vrot.slane %v927_v29, %v854_v18  ;;  %v423_v40 = vmul.f32 %v927_v29, %v927_v29  ;;  %v340_v47 = vadd.f32 %v339_v38, %v338_v33 }
  0x53   :  { %v476_v51 = vsel %vm139_vm0, %v469_v34, 0.0  ;;  %v477_v52 = vsel %vm139_vm0, %v473_v39, 0.0  ;;  %v299_v53 = vadd.f32 %v298_v45, %v297_v43 }
  0x54   :  { %v418_v41 = vsel %vm139_vm0, %v411_v35, 0.0  ;;  %v419_v42 = vsel %vm139_vm0, %v415_v36, 0.0  ;;  %v428_v48 = vrot.slane %v423_v40, %v849_v13  ;;  %v432_v50 = vrot.slane %v423_v40, %v854_v18 }
  0x55   :  { %v420_v46 = vadd.f32 %v419_v42, %v418_v41  ;;  %v478_v57 = vadd.f32 %v477_v52, %v476_v51 }
  0x56   :  { %201 = vadd.xlane.f32.xlu1 %v200_v32  ;;  %v435_v54 = vsel %vm139_vm0, %v428_v48, 0.0  ;;  %v436_v56 = vsel %vm139_vm0, %v432_v50, 0.0 }
  0x57   :  { %421 = vadd.xlane.f32.xlu0 %v420_v46  ;;  %v437_v58 = vadd.f32 %v436_v56, %v435_v54 }
  0x5a   :  { %341 = vadd.xlane.f32.xlu1 %v340_v47 }
  0x5b   :  { %300 = vadd.xlane.f32.xlu0 %v299_v53 }
  0x5e   :  { %479 = vadd.xlane.f32.xlu1 %v478_v57 }
  0x5f   :  { %438 = vadd.xlane.f32.xlu0 %v437_v58 }
  0xd4   :  { %v324_v59 = vpop.xlane.xlu1 %323 }
  0xd5   :  { %v344_v60 = vrot.slane %v324_v59, 4 }
  0xd6   :  { %v144_v61 = vpop.xlane.xlu0 %143 }
  0xd7   :  { %v162_v62 = vrot.slane %v144_v61, 4  ;;  %v345_v1 = vadd.f32 %v344_v60, %v324_v59 }
  0xd9   :  { %v163_v63 = vadd.f32 %v162_v62, %v144_v61  ;;  %v346_v15 = vrot.slane %v345_v1, 2 }
  0xda   :  { %v184_v3 = vpop.xlane.xlu0 %183 }
  0xdb   :  { %v462_v2 = vpop.xlane.xlu1 %461  ;;  %v204_v4 = vrot.slane %v184_v3, 4  ;;  %v164_v5 = vrot.slane %v163_v63, 2  ;;  %v185_v6 = vadd.f32 %v184_v3, %v144_v61  ;;  %v347_v14 = vadd.f32 %v346_v15, %v345_v1 }
  0xdc   :  { %v482_v7 = vrot.slane %v462_v2, 4  ;;  %v219_v15 = vstv %s623_s28 }
  0xdd   :  { %v205_v9 = vadd.f32 %v204_v4, %v184_v3  ;;  %v165_v10 = vadd.f32 %v164_v5, %v163_v63  ;;  %v951_v19 = vmul.f32 0.001953125, %v185_v6  ;;  %v348_v41 = vrot.slane %v347_v14, 1 }
  0xde   :  { %v284_v12 = vpop.xlane.xlu0 %283  ;;  %v483_v21 = vadd.f32 %v482_v7, %v462_v2 }
  0xdf   :  { %v161_v11 = vpop.xlane.xlu1 %160  ;;  %v302_v16 = vrot.slane %v284_v12, 4  ;;  %v166_v17 = vrot.slane %v165_v10, 1  ;;  %v206_v20 = vrot.slane %v205_v9, 2  ;;  %v325_v24 = vadd.f32 %v324_v59, %v284_v12 }
  0xe0   :  { %v214_v30 = vmul.f32 %v951_v19, %v951_v19  ;;  %v484_v36 = vrot.slane %v483_v21, 2  ;;  %v349_v54 = vadd.f32 %v348_v41, %v347_v14 }
  0xe1   :  { %v303_v22 = vadd.f32 %v302_v16, %v284_v12  ;;  %v167_v23 = vadd.f32 %v166_v17, %v165_v10  ;;  %v207_v8 = vadd.f32 %v206_v20, %v205_v9  ;;  %v955_v38 = vmul.f32 0.001953125, %v325_v24 }
  0xe2   :  { %v485_v52 = vadd.f32 %v484_v36, %v483_v21  ;;  %v222_v21 = vstv %s626_s29  ;;  %v359_v24 = vstv %s624_s30 }
  0xe3   :  { %v202_v26 = vpop.xlane.xlu1 %201  ;;  %632 = vpush %v167_v23  ;;  %v304_v28 = vrot.slane %v303_v22, 2  ;;  %v208_v32 = vrot.slane %v207_v8, 1  ;;  %v354_v59 = vmul.f32 %v955_v38, %v955_v38 }
  0xe4   :  { %v203_v27 = vadd.f32 %v202_v26, %v161_v11  ;;  %v422_v31 = vpop.xlane.xlu0 %421 }
  0xe5   :  { %v440_v34 = vrot.slane %v422_v31, 4  ;;  %v305_v35 = vadd.f32 %v304_v28, %v303_v22  ;;  %v209_v40 = vadd.f32 %v208_v32, %v207_v8  ;;  %v463_v45 = vadd.f32 %v462_v2, %v422_v31 }
  0xe6   :  { %v213_v33 = vmul.f32 0.001953125, %v203_v27  ;;  %v486_v2 = vrot.slane %v485_v52, 1  ;;  %v497_v32 = vstv %s625_s6 }
  0xe7   :  { %v342_v39 = vpop.xlane.xlu1 %341  ;;  %v441_v43 = vadd.f32 %v440_v34, %v422_v31  ;;  %v306_v46 = vrot.slane %v305_v35, 1  ;;  %634 = vpush %v209_v40  ;;  %v490_v58 = vmul.f32 0.001953125, %v463_v45  ;;  %v362_v31 = vstv %s627_s1 }
  0xe8   :  { %v215_v42 = vsub.f32 %v213_v33, %v214_v30  ;;  %v301_v47 = vpop.xlane.xlu0 %300  ;;  %v487_v11 = vadd.f32 %v486_v2, %v485_v52 }
  0xe9   :  { %v343_v50 = vadd.f32 %v342_v39, %v301_v47  ;;  %v307_v51 = vadd.f32 %v306_v46, %v305_v35  ;;  %v442_v56 = vrot.slane %v441_v43, 2  ;;  %v492_v5 = vmul.f32 %v490_v58, %v490_v58 }
  0xea   :  { %v216_v48 = vmax.f32 %v215_v42, 0.0  ;;  %v500_v42 = vstv %s961_s7  ;;  %s540_s7 = smul.f32 0.9, %s631_s23 }
  0xeb   :  { %v480_v53 = vpop.xlane.xlu1 %479  ;;  %v353_v60 = vmul.f32 0.001953125, %v343_v50  ;;  %636 = vpush %v307_v51  ;;  %v443_v62 = vadd.f32 %v442_v56, %v441_v43  ;;  %v246_v43 = vld [vmem:[#allocation8] ss:$8 sm:$0x3] }
  0xec   :  { %v217_v57 = vadd.f32 1e-05, %v216_v48  ;;  %v439_v61 = vpop.xlane.xlu0 %438  ;;  %638 = vpush %v349_v54  ;;  %v258_v48 = vld [vmem:[#allocation8 + $0x3] ss:$8 sm:$0x3] }
  0xed   :  { %v355_v63 = vsub.f32 %v353_v60, %v354_v59  ;;  %v481_v1 = vadd.f32 %v480_v53, %v439_v61  ;;  %v444_v3 = vrot.slane %v443_v62, 1 }
  0xee   :  { %652 = vrsqrt.f32 %v217_v57 }
  0xef   :  { %v356_v4 = vmax.f32 %v355_v63, 0.0  ;;  %v491_v6 = vmul.f32 0.001953125, %v481_v1  ;;  %v445_v7 = vadd.f32 %v444_v3, %v443_v62  ;;  %v384_v63 = vld [vmem:[#allocation8 + $0x1] ss:$8 sm:$0x3] }
  0xf0   :  { %v396_v1 = vld [vmem:[#allocation8 + $0x4] ss:$8 sm:$0x3] }
  0xf1   :  { %v357_v9 = vadd.f32 1e-05, %v356_v4  ;;  %v493_v10 = vsub.f32 %v491_v6, %v492_v5  ;;  %640 = vpush %v445_v7 }
  0xf2   :  { %642 = vpush %v487_v11 }
  0xf3   :  { %654 = vrsqrt.f32 %v357_v9  ;;  %v494_v12 = vmax.f32 %v493_v10, 0.0  ;;  %v522_v10 = vld [vmem:[#allocation8 + $0x2] ss:$8 sm:$0x3] }
  0xf5   :  { %v495_v16 = vadd.f32 1e-05, %v494_v12 }
  0xf7   :  { %656 = vrsqrt.f32 %v495_v16 }
  0xf8   :  { %v653_v17 = vpop.eup %652 }
  0xf9   :  { %v220_v20 = vmul.f32 %v653_v17, %v219_v15 }
  0xfb   :  { %v221_v22 = vmul.f32 %v220_v20, %v951_v19  ;;  %v228_v23 = vrot.slane %v220_v20, %v849_v13 }
  0xfd   :  { %v223_v26 = vsub.f32 %v222_v21, %v221_v22  ;;  %v655_v8 = vpop.eup %654  ;;  %v230_v14 = vmul.f32 %v228_v23, %v871_v37  ;;  %v250_v28 = vmul.f32 %v228_v23, %v881_v49 }
  0xfe   :  { %v360_v30 = vmul.f32 %v655_v8, %v359_v24 }
  0xff   :  { %v235_v27 = vrot.slane %v223_v26, %v849_v13 }
 0x100   :  { %v361_v33 = vmul.f32 %v360_v30, %v955_v38  ;;  %v368_v19 = vrot.slane %v360_v30, %v849_v13 }
 0x101   :  { %v237_v34 = vadd.f32 %v235_v27, %v230_v14  ;;  %v251_v35 = vadd.f32 %v250_v28, %v235_v27  ;;  %v657_v36 = vpop.eup %656 }
 0x102   :  { %v363_v39 = vsub.f32 %v362_v31, %v361_v33  ;;  %v498_v40 = vmul.f32 %v657_v36, %v497_v32  ;;  %v370_v37 = vmul.f32 %v368_v19, %v875_v44  ;;  %v388_v49 = vmul.f32 %v368_v19, %v861_v25 }
 0x103   :  { %v238_v41 = vmax.f32 %v237_v34, 0.0  ;;  %v252_v45 = vmax.f32 %v251_v35, 0.0 }
 0x104   :  { %v499_v38 = vmul.f32 %v498_v40, %v490_v58  ;;  %v375_v50 = vrot.slane %v363_v39, %v849_v13  ;;  %v506_v51 = vrot.slane %v498_v40, %v849_v13 }
 0x105   :  { %v239_v47 = vmin.f32 %v238_v41, 6.0  ;;  %v253_v52 = vmin.f32 %v252_v45, 6.0 }
 0x106   :  { %v377_v54 = vadd.f32 %v375_v50, %v370_v37  ;;  %v389_v44 = vadd.f32 %v388_v49, %v375_v50  ;;  %v501_v56 = vsub.f32 %v500_v42, %v499_v38  ;;  %v508_v0 = vmul.f32 %v506_v51, %v927_v29 }
 0x107   :  { %v247_v53 = vsub.f32 %v239_v47, %v246_v43  ;;  %244 = vst.msk [vmem:[#allocation10] ss:$8 sm:$0x3] %vm972_vm1, %v239_v47  ;;  %v259_v25 = vsub.f32 %v253_v52, %v258_v48  ;;  %255 = vst.msk [vmem:[#allocation10 + $0x3] ss:$8 sm:$0x3] %vm972_vm1, %v253_v52  ;;  %v526_v60 = vmul.f32 %v506_v51, %v891_v55 }
 0x108   :  { %v378_v57 = vmax.f32 %v377_v54, 0.0  ;;  %v390_v58 = vmax.f32 %v389_v44, 0.0  ;;  %v513_v59 = vrot.slane %v501_v56, %v849_v13  ;;  %v534_v55 = vld [vmem:[#allocation8 + $0x5] ss:$8 sm:$0x3] }
 0x109   :  { %v248_v61 = vmul.f32 %v247_v53, %v247_v53  ;;  %v260_v62 = vmul.f32 %v259_v25, %v259_v25 }
 0x10a   :  { %v379_v2 = vmin.f32 %v378_v57, 6.0  ;;  %v391_v3 = vmin.f32 %v390_v58, 6.0  ;;  %v515_v4 = vadd.f32 %v513_v59, %v508_v0  ;;  %v527_v5 = vadd.f32 %v526_v60, %v513_v59 }
 0x10b   :  { %v261_v11 = vadd.f32 %v260_v62, %v248_v61 }
 0x10c   :  { %v385_v6 = vsub.f32 %v379_v2, %v384_v63  ;;  %v397_v7 = vsub.f32 %v391_v3, %v396_v1  ;;  %v516_v29 = vmax.f32 %v515_v4, 0.0  ;;  %v528_v9 = vmax.f32 %v527_v5, 0.0  ;;  %381 = vst.msk [vmem:[#allocation10 + $0x1] ss:$8 sm:$0x3] %vm972_vm1, %v379_v2 }
 0x10d   :  { %393 = vst.msk [vmem:[#allocation10 + $0x4] ss:$8 sm:$0x3] %vm972_vm1, %v391_v3 }
 0x10e   :  { %v386_v12 = vmul.f32 %v385_v6, %v385_v6  ;;  %v517_v15 = vmin.f32 %v516_v29, 6.0  ;;  %v529_v16 = vmin.f32 %v528_v9, 6.0  ;;  %v398_v20 = vmul.f32 %v397_v7, %v397_v7 }
 0x110   :  { %v387_v17 = vadd.f32 %v386_v12, %v261_v11  ;;  %v523_v21 = vsub.f32 %v517_v15, %v522_v10  ;;  %v535_v22 = vsub.f32 %v529_v16, %v534_v55  ;;  %519 = vst.msk [vmem:[#allocation10 + $0x2] ss:$8 sm:$0x3] %vm972_vm1, %v517_v15  ;;  %531 = vst.msk [vmem:[#allocation10 + $0x5] ss:$8 sm:$0x3] %vm972_vm1, %v529_v16 }
 0x112   :  { %v399_v23 = vadd.f32 %v398_v20, %v387_v17  ;;  %v524_v24 = vmul.f32 %v523_v21, %v523_v21  ;;  %v536_v8 = vmul.f32 %v535_v22, %v535_v22 }
 0x114   :  { %v525_v26 = vadd.f32 %v524_v24, %v399_v23  ;;  %s633_s10 = spop %632 }
 0x116   :  { %v537_v14 = vadd.f32 %v536_v8, %v525_v26 }
 0x118   :  { %v549_v27 = vrot.slane %v537_v14, %v849_v13  ;;  %v553_v28 = vrot.slane %v537_v14, %v854_v18  ;;  %s635_s11 = spop %634 }
 0x119   :  { %s211_s12 = sadd.f32 %s635_s11, %s633_s10  ;;  %s771_s10 = smov [#allocation10]  }
 0x11a   :  { %v556_v30 = vsel %vm139_vm0, %v549_v27, 0.0  ;;  %v557_v31 = vsel %vm139_vm0, %v553_v28, 0.0  ;;  %s576_s11 = sshll.u32 %s771_s10, 4  ;;  %s577_s11 = int_to_ptr.vmem [resolvable:$true] %s576_s11 }
 0x11b   :  { %v558_v32 = vadd.f32 %v557_v31, %v556_v30  ;;  %s262_s15 = smul.f32 0.001953125, %s211_s12  ;;  %s714_s12 = scalar_lea.vmem %s577_s11, 256 }
 0x11c   :  { %s637_s0 = spop %636  ;;  %p715_p7 = scmp.ne.s32.totalorder %s577_s11, %s714_s12 }
 0x11d   :  { %559 = vadd.xlane.f32.xlu0 %v558_v32  ;;  %s639_s16 = spop %638  ;;  %s263_s17 = sadd.f32 %s620_s8, %s262_s15 }
 0x11e   :  { %s351_s19 = sadd.f32 %s639_s16, %s637_s0  ;;  %p719_p8 = scmp.lt.s32.totalorder %s577_s11, %s577_s11 }
 0x11f   :  { %s265_s20 = smul.f32 0.1, %s263_s17  ;;  %p720_p9 = scmp.lt.s32.totalorder %s714_s12, %s714_s12 }
 0x120   :  { %s400_s22 = smul.f32 0.001953125, %s351_s19 }
 0x121   :  { %s266_s24 = sadd.f32 %s265_s20, %s264_s18  ;;  %p721_p10 = por %p720_p9, %p719_p8 }
 0x122   :  { %s401_s25 = sadd.f32 %s621_s14, %s400_s22  ;;  %s641_s26 = spop %640 }
 0x123   :  { %s643_s27 = spop %642  ;;  %268 = sst [smem:[#allocation11]] %s266_s24 }
 0x124   :  { %s403_s28 = smul.f32 0.1, %s401_s25  ;;  %s489_s29 = sadd.f32 %s643_s27, %s641_s26 }
 0x125   :  { %p722_p11 = pnand %p721_p10, %p715_p7 }
 0x126   :  { %s538_s30 = smul.f32 0.001953125, %s489_s29  ;;  %s404_s1 = sadd.f32 %s403_s28, %s402_s2 }
 0x128   :  { %s539_s6 = sadd.f32 %s622_s21, %s538_s30 }
 0x129   :  { %406 = sst [smem:[#allocation11 + $0x1]] %s404_s1 }
 0x12a   :  { %s541_s8 = smul.f32 0.1, %s539_s6 }
 0x12c   :  { %s542_s9 = sadd.f32 %s541_s8, %s540_s7 }
 0x12e   :  { %544 = sst [smem:[#allocation11 + $0x2]] %s542_s9 }
 0x12f   :  { %725 = shalt.err (!%p722_p11)
}
 0x130   :  { %s726_s15 = scalar_lea.hbm %s1036_s3, 256 }
 0x131   :  { %p727_p12 = scmp.ne.s32.totalorder %s1036_s3, %s726_s15  ;;  %p730_p13 = scmp.lt.u32.totalorder %s726_s15, %s1036_s3 }
 0x133   :  { %p732_p0 = pnand %p730_p13, %p727_p12 }
 0x135   :  { %735 = shalt.err (!%p732_p0)
}
 0x136   :  { %579 = dma.vmem_to_hbm [thread:$0]  %s577_s11, 256, %s1036_s3, [#allocation4]  }
 0x137   :  { %s736_s23 = scalar_lea.hbm %s1037_s4, 16 }
 0x138   :  { %p737_p1 = scmp.ne.s32.totalorder %s1037_s4, %s736_s23  ;;  %p740_p2 = scmp.lt.u32.totalorder %s736_s23, %s1037_s4 }
 0x13a   :  { %p742_p3 = pnand %p740_p2, %p737_p1 }
 0x13c   :  { %745 = shalt.err (!%p742_p3)
}
 0x13d   :  { %s772_s27 = smov [#allocation11]   ;;  %s746_s6 = scalar_lea.hbm %s1038_s5, 16 }
 0x13e   :  { %587 = dma.smem_to_hbm %s772_s27, 16, %s1037_s4, [#allocation5]  }
 0x13f   :  { %p747_p4 = scmp.ne.s32.totalorder %s1038_s5, %s746_s6  ;;  %p750_p5 = scmp.lt.u32.totalorder %s746_s6, %s1038_s5 }
 0x141   :  { %p752_p6 = pnand %p750_p5, %p747_p4 }
 0x1aa   :  { %v560_v13 = vpop.xlane.xlu0 %559 }
 0x1ab   :  { %v561_v18 = vrot.slane %v560_v13, 4 }
 0x1ad   :  { %v562_v33 = vadd.f32 %v561_v18, %v560_v13 }
 0x1af   :  { %v563_v19 = vrot.slane %v562_v33, 2 }
 0x1b1   :  { %v564_v34 = vadd.f32 %v563_v19, %v562_v33 }
 0x1b3   :  { %v565_v35 = vrot.slane %v564_v34, 1 }
 0x1b5   :  { %v566_v36 = vadd.f32 %v565_v35, %v564_v34 }
 0x1b7   :  { %644 = vpush %v566_v36 }
 0x1e8   :  { %s645_s3 = spop %644 }
 0x1e9   :  { %569 = sst [smem:[#allocation12]] %s645_s3 }
 0x1ea   :  { %755 = shalt.err (!%p752_p6)
}
 0x1eb   :  { %s773_s10 = smov [#allocation12]  }
 0x1ec   :  { %595 = dma.smem_to_hbm %s773_s10, 16, %s1038_s5, [#allocation13]  }
 0x1ed   :  { %762 = dma.done.wait [#allocation4], 256  }
 0x1ee   :  { %763 = vsyncadd [#allocation4], 4294967040 }
 0x1ef   :  { %764 = dma.done.wait [#allocation5], 16  }
 0x1f0   :  { %765 = vsyncadd [#allocation5], 4294967280 }
 0x1f1   :  { %766 = dma.done.wait [#allocation13], 16  }
 0x1f2   :  { %767 = vsyncadd [#allocation13], 4294967280 }
 0x1f3   :  { %605 = sfence }
 0x1f4   :  { %606 = vsyncpa [#allocation3], 1 }
 0x1f5   :  { %607 = vsyncpa [#allocation9], 1 }
 0x1f6   :  { %608 = vsyncpa [#allocation4], 1 }
 0x1f7   :  { %609 = vsyncpa [#allocation5], 1 }
 0x1f8   :  { %610 = vsyncpa [#allocation13], 1 }
 0x1f9   :  { %611 = vsyncpa [#allocation6], 1 }

</bundles_post_ra>
